<compile_context>
chip_gen: v6e
topology: v6e:2x2x1
jax: 0.10.0
libtpu: 0.0.40
codegen_flags: <defaults>
</compile_context>

<pallas_src>
import functools

import jax
import jax.numpy as jnp
from jax.experimental import pallas as pl
from jax.experimental.pallas import tpu as pltpu

BN_EPS = 1e-5


# ----------------------------------------------------------------------------
# Pass 1: per-probe partial sum / sum-of-squares of diff = (probe - gallery)^2
# accumulated over the g axis into (SUB, F) partials (SUB = 8 when possible).
# ----------------------------------------------------------------------------
def _stats_kernel(probe_ref, gallery_ref, sum_ref, sq_ref, *, tile_g, g_total, sub):
    g = pl.program_id(1)

    @pl.when(g == 0)
    def _():
        sum_ref[...] = jnp.zeros_like(sum_ref)
        sq_ref[...] = jnp.zeros_like(sq_ref)

    d = probe_ref[...] - gallery_ref[...]        # (1,F) - (TILE_G,F) -> (TILE_G,F)
    d = d * d                                    # x = (p - g)^2  (BN input)

    def accumulate(x):
        # (TILE_G, F) -> (TILE_G//SUB, SUB, F): axis-0 sum is vreg+vreg adds,
        # no cross-sublane reduce inside the kernel (done once in the wrapper).
        xr = x.reshape(tile_g // sub, sub, x.shape[-1])
        sum_ref[...] += jnp.sum(xr, axis=0)                 # (SUB, F)
        sq_ref[...] += jnp.sum(xr * xr, axis=0)             # (SUB, F)

    if g_total % tile_g != 0:
        last = pl.num_programs(1) - 1

        @pl.when(g != last)          # interior tiles: no masking cost
        def _():
            accumulate(d)

        @pl.when(g == last)          # ragged tail: mask out-of-bounds rows
        def _():
            row = jax.lax.broadcasted_iota(jnp.int32, d.shape, 0)
            accumulate(jnp.where(row < g_total - g * tile_g, d, 0.0))
    else:
        accumulate(d)


# ----------------------------------------------------------------------------
# Pass 2: per tile, logits = diff @ W_eff + b_eff  (BN folded into W_eff/b_eff)
# ----------------------------------------------------------------------------
def _apply_kernel(probe_ref, gallery_ref, w_ref, b_ref, out_ref):
    d = probe_ref[...] - gallery_ref[...]        # (TILE_G, F), f32
    d = d * d
    logits = jnp.dot(d.astype(w_ref.dtype), w_ref[...],     # (TILE_G, TILE_C)
                     preferred_element_type=jnp.float32)
    out_ref[...] = (logits + b_ref[...]).astype(out_ref.dtype)


# ----------------------------------------------------------------------------
# Tiling / VMEM helpers
# ----------------------------------------------------------------------------
def _round_up(x, m):
    return (x + m - 1) // m * m


def _align_tile(t, total):
    """Clamp a row tile to [8, total]; 8-align it unless it covers the array."""
    t = min(total, max(8, int(t)))
    if t < total:
        t = max(8, (t // 8) * 8)
    return t


def _vmem_limit_bytes():
    """Generation-aware scoped-VMEM request (3/4 of physical, <=100 MiB)."""
    cap = 128 << 20
    try:
        info = pltpu.get_tpu_info()
        cap = int(getattr(info, "vmem_capacity_bytes", cap)) or cap
    except Exception:
        cap = 64 << 20          # be conservative if the query is unavailable
    return min(cap * 3 // 4, 100 << 20)   # ~96-100 MiB v5e/v6e, ~48 MiB v7x


def _pick_tile_g_stats(G, F, budget):
    """Pass 1 rows/tile: only the f32 gallery tile is VMEM-resident (x2 bufs)."""
    per_row = F * 4 * 2
    return _align_tile(budget // max(per_row, 1), G)


def _pick_tile_c(F, C_pad, budget):
    """Class tile: keep the (F, TILE_C) weight (x2 bufs) under ~1/3 budget."""
    per_col = F * 4 * 2                       # conservative: f32-sized, x2 bufs
    max_cols = max(128, (budget // 3) // max(per_col, 1))
    if max_cols >= C_pad:
        return C_pad
    t = max(128, (max_cols // 128) * 128)
    if t >= 256:
        t = (t // 256) * 256                  # feed the 256-wide MXU N dim
    return min(t, C_pad)


def _pick_tile_g_apply(G, F, tile_c, budget):
    """Pass 2 rows/tile: budget includes weight/bias/probe residents."""
    fixed = (F * tile_c * 4 * 2               # weight (conservative f32, x2)
             + tile_c * 4 * 2                 # bias
             + F * 4 * 2)                     # probe row
    per_row = (F * 4 + tile_c * 4) * 2        # gallery in + logits out, x2 bufs
    avail = max(budget - fixed, per_row * 8)
    return _align_tile(avail // per_row, G)


# ----------------------------------------------------------------------------
# Forward
# ----------------------------------------------------------------------------
@functools.partial(
    jax.jit,
    static_argnames=("tile_g_stats", "tile_g_apply", "tile_c", "use_bf16_matmul"))
def classifier_forward(probe, gallery, bn_weight, bn_bias, lin_weight, lin_bias,
                       *, tile_g_stats=None, tile_g_apply=None, tile_c=None,
                       use_bf16_matmul=True):
    """probe: (P, F), gallery: (P, G, F), lin_weight: (C, F) torch layout."""
    P, G, F = gallery.shape
    C = lin_weight.shape[0]
    C_pad = _round_up(C, 128)                 # lane-dense output stores

    vmem_limit = _vmem_limit_bytes()
    budget = vmem_limit // 2                  # headroom for compiler scratch

    TG1 = _align_tile(tile_g_stats if tile_g_stats is not None
                      else _pick_tile_g_stats(G, F, budget), G)
    TC = tile_c if tile_c is not None else _pick_tile_c(F, C_pad, budget)
    TC = min(_round_up(int(TC), 128), C_pad)
    TG2 = _align_tile(tile_g_apply if tile_g_apply is not None
                      else _pick_tile_g_apply(G, F, TC, budget), G)

    GT1 = pl.cdiv(G, TG1)
    GT2 = pl.cdiv(G, TG2)
    CT = pl.cdiv(C_pad, TC)
    SUB = 8 if TG1 % 8 == 0 else 1            # sublane-aligned partial height

    probe3 = probe.reshape(P, 1, F)           # free metadata reshape in XLA

    # ---- pass 1: per-probe partial BN batch statistics ----------------------
    psum, psq = pl.pallas_call(
        functools.partial(_stats_kernel, tile_g=TG1, g_total=G, sub=SUB),
        out_shape=(jax.ShapeDtypeStruct((P, SUB, F), jnp.float32),
                   jax.ShapeDtypeStruct((P, SUB, F), jnp.float32)),
        grid=(P, GT1),
        in_specs=[pl.BlockSpec((pl.Squeezed(), 1, F), lambda p, g: (p, 0, 0)),
                  pl.BlockSpec((pl.Squeezed(), TG1, F), lambda p, g: (p, g, 0))],
        out_specs=(pl.BlockSpec((pl.Squeezed(), SUB, F), lambda p, g: (p, 0, 0)),
                   pl.BlockSpec((pl.Squeezed(), SUB, F), lambda p, g: (p, 0, 0))),
        compiler_params=pltpu.CompilerParams(
            dimension_semantics=("parallel", "arbitrary"),
            vmem_limit_bytes=vmem_limit),
    )(probe3, gallery)

    # ---- fold BN (training-mode batch stats) into the linear layer ----------
    n = float(P * G)
    sum_ = jnp.sum(psum, axis=(0, 1))                          # (F,)
    sumsq = jnp.sum(psq, axis=(0, 1))                          # (F,)
    mean = sum_ / n
    # TODO(synk): one-pass variance (E[x^2] - mean^2) in f32 can lose accuracy
    # vs the reference's centered variance for very large P*G; a shifted or
    # compensated accumulation would tighten BN-scale accuracy if needed.
    var = jnp.maximum(sumsq / n - mean * mean, 0.0)            # biased variance
    s = bn_weight * jax.lax.rsqrt(var + BN_EPS)                # (F,)
    w_t = lin_weight.T                                         # (F, C)
    w_dtype = jnp.bfloat16 if use_bf16_matmul else jnp.float32
    w_eff = jnp.pad(s[:, None] * w_t,
                    ((0, 0), (0, C_pad - C))).astype(w_dtype)  # (F, C_pad)
    b_eff = (bn_bias - mean * s) @ w_t + lin_bias              # (C,)
    b_eff = jnp.pad(b_eff, (0, C_pad - C)).reshape(1, C_pad).astype(jnp.float32)

    # ---- pass 2: tiled diff + matmul (class axis tiled) ----------------------
    out = pl.pallas_call(
        _apply_kernel,
        out_shape=jax.ShapeDtypeStruct((P, G, C_pad), jnp.float32),
        grid=(P, CT, GT2),                     # g innermost: weight tile reused
        in_specs=[pl.BlockSpec((pl.Squeezed(), 1, F), lambda p, c, g: (p, 0, 0)),
                  pl.BlockSpec((pl.Squeezed(), TG2, F), lambda p, c, g: (p, g, 0)),
                  pl.BlockSpec((F, TC), lambda p, c, g: (0, c)),
                  pl.BlockSpec((1, TC), lambda p, c, g: (0, c))],
        out_specs=pl.BlockSpec((pl.Squeezed(), TG2, TC), lambda p, c, g: (p, g, c)),
        compiler_params=pltpu.CompilerParams(
            dimension_semantics=("parallel", "parallel", "arbitrary"),
            vmem_limit_bytes=vmem_limit),
    )(probe3, gallery, w_eff, b_eff)

    # No-op when C % 128 == 0; otherwise an XLA copy — consumers that accept
    # the padded (P, G, C_pad) layout should take `out` directly.
    return out[:, :, :C]


# ----------------------------------------------------------------------------
# Pure-JAX reference (f32 throughout)
# ----------------------------------------------------------------------------
def classifier_reference(probe, gallery, bn_weight, bn_bias, lin_weight, lin_bias):
    P, G, F = gallery.shape
    diff = (probe[:, None, :] - gallery) ** 2
    diff = diff.reshape(P * G, F)
    mean = jnp.mean(diff, axis=0, keepdims=True)
    var = jnp.mean((diff - mean) ** 2, axis=0, keepdims=True)
    y = (diff - mean) / jnp.sqrt(var + BN_EPS) * bn_weight + bn_bias
    out = y @ lin_weight.T + lin_bias
    return out.reshape(P, G, -1)


if __name__ == "__main__":
    key = jax.random.PRNGKey(0)

    def run_case(P, G, F, C, **kw):
        k1, k2, k3 = jax.random.split(jax.random.fold_in(key, P * 1000 + G), 3)
        probe = jax.random.normal(k1, (P, F), dtype=jnp.float32)
        gallery = jax.random.normal(k2, (P, G, F), dtype=jnp.float32)
        # deterministic parameter init mirroring the module's __init__
        bn_w = jnp.ones((F,), jnp.float32)                       # constant 1
        bn_b = jnp.zeros((F,), jnp.float32)                      # constant 0
        lin_w = 0.001 * jax.random.normal(k3, (C, F), jnp.float32)  # std=0.001
        lin_b = jnp.zeros((C,), jnp.float32)                     # constant 0

        out = classifier_forward(probe, gallery, bn_w, bn_b, lin_w, lin_b, **kw)
        out = jax.block_until_ready(out)
        ref = classifier_reference(probe, gallery, bn_w, bn_b, lin_w, lin_b)
        assert out.shape == (P, G, C), out.shape
        # bf16 MXU operands (f32 accumulate) -> slightly looser tolerance
        assert jnp.allclose(out, ref, atol=5e-4, rtol=5e-2), (
            float(jnp.max(jnp.abs(out - ref))))

    # module-consistent small shapes
    run_case(2, 8, 32, 16)
    # ragged gallery tiles (G % TILE_G != 0) + multi-probe partial stats
    run_case(3, 13, 32, 16, tile_g_stats=8, tile_g_apply=8)
    # class-tiling path (C_pad > TILE_C) + f32 matmul fallback
    run_case(2, 16, 32, 300, tile_g_stats=8, tile_g_apply=8, tile_c=128,
             use_bf16_matmul=False)

    # TODO(synk): the >=50000-row sliced path of the original module computes
    # BN statistics per 50000-row slice (a memory workaround with different
    # semantics); only the global-batch-statistics branch is implemented here.
    print("KERNEL_OK")
</pallas_src>

<mosaic_0001>
module attributes {stable_mosaic.version = 11 : i64} {
  func.func @_stats_kernel(%arg0: i32, %arg1: i32, %arg2: memref<1x1x32xf32, #tpu.memory_space<vmem>>, %arg3: memref<1x8x32xf32, #tpu.memory_space<vmem>>, %arg4: memref<1x8x32xf32, #tpu.memory_space<vmem>>, %arg5: memref<1x8x32xf32, #tpu.memory_space<vmem>>) attributes {dimension_semantics = [#tpu.dimension_semantics<parallel>, #tpu.dimension_semantics<arbitrary>], iteration_bounds = array<i64: 2, 1>, scalar_prefetch = 0 : i64, scratch_operands = 0 : i64, tpu.core_type = #tpu.core_type<tc>, window_params = [{transform_indices = @transform_0, window_bounds = array<i64: 1, 1, 32>}, {transform_indices = @transform_1, window_bounds = array<i64: 1, 8, 32>}, {transform_indices = @transform_2, window_bounds = array<i64: 1, 8, 32>}, {transform_indices = @transform_3, window_bounds = array<i64: 1, 8, 32>}]} {
    %c0_i32 = arith.constant 0 : i32
    %0 = arith.cmpi eq, %arg1, %c0_i32 : i32
    %1 = arith.extui %0 : i1 to i32
    %c0_i32_0 = arith.constant 0 : i32
    %2 = arith.cmpi ne, %1, %c0_i32_0 : i32
    scf.if %2 {
      %cst_19 = arith.constant 0.000000e+00 : f32
      %26 = vector.broadcast %cst_19 : f32 to vector<8x32xf32>
      %c0_20 = arith.constant 0 : index
      %c0_21 = arith.constant 0 : index
      %c0_22 = arith.constant 0 : index
      %27 = vector.load %arg4[%c0_20, %c0_21, %c0_22] : memref<1x8x32xf32, #tpu.memory_space<vmem>>, vector<1x8x32xf32>
      %28 = vector.shape_cast %27 : vector<1x8x32xf32> to vector<8x32xf32>
      %29 = vector.shape_cast %26 : vector<8x32xf32> to vector<1x8x32xf32>
      tpu.vector_store %arg4[%c0_20, %c0_21, %c0_22], %29 {strides = array<i32>} : memref<1x8x32xf32, #tpu.memory_space<vmem>>, vector<1x8x32xf32>,
      %cst_23 = arith.constant 0.000000e+00 : f32
      %30 = vector.broadcast %cst_23 : f32 to vector<8x32xf32>
      %c0_24 = arith.constant 0 : index
      %c0_25 = arith.constant 0 : index
      %c0_26 = arith.constant 0 : index
      %31 = vector.load %arg5[%c0_24, %c0_25, %c0_26] : memref<1x8x32xf32, #tpu.memory_space<vmem>>, vector<1x8x32xf32>
      %32 = vector.shape_cast %31 : vector<1x8x32xf32> to vector<8x32xf32>
      %33 = vector.shape_cast %30 : vector<8x32xf32> to vector<1x8x32xf32>
      tpu.vector_store %arg5[%c0_24, %c0_25, %c0_26], %33 {strides = array<i32>} : memref<1x8x32xf32, #tpu.memory_space<vmem>>, vector<1x8x32xf32>,
    } else {
    }
    %c0 = arith.constant 0 : index
    %c0_1 = arith.constant 0 : index
    %c0_2 = arith.constant 0 : index
    %3 = vector.load %arg2[%c0, %c0_1, %c0_2] : memref<1x1x32xf32, #tpu.memory_space<vmem>>, vector<1x1x32xf32>
    %4 = vector.shape_cast %3 : vector<1x1x32xf32> to vector<1x32xf32>
    %c0_3 = arith.constant 0 : index
    %c0_4 = arith.constant 0 : index
    %c0_5 = arith.constant 0 : index
    %5 = vector.load %arg3[%c0_3, %c0_4, %c0_5] : memref<1x8x32xf32, #tpu.memory_space<vmem>>, vector<1x8x32xf32>
    %6 = vector.shape_cast %5 : vector<1x8x32xf32> to vector<8x32xf32>
    %7 = vector.broadcast %4 : vector<1x32xf32> to vector<8x32xf32>
    %8 = arith.subf %7, %6 : vector<8x32xf32>
    %9 = arith.mulf %8, %8 : vector<8x32xf32>
    %10 = vector.shape_cast %9 : vector<8x32xf32> to vector<1x8x32xf32>
    %c0_6 = arith.constant 0 : index
    %c0_7 = arith.constant 0 : index
    %c0_8 = arith.constant 0 : index
    %11 = vector.load %arg4[%c0_6, %c0_7, %c0_8] : memref<1x8x32xf32, #tpu.memory_space<vmem>>, vector<1x8x32xf32>
    %12 = vector.shape_cast %11 : vector<1x8x32xf32> to vector<8x32xf32>
    %cst = arith.constant dense<0.000000e+00> : vector<8x32xf32>
    %13 = vector.multi_reduction <add>, %10, %cst [0] : vector<1x8x32xf32> to vector<8x32xf32>
    %14 = arith.addf %12, %13 : vector<8x32xf32>
    %c0_9 = arith.constant 0 : index
    %c0_10 = arith.constant 0 : index
    %c0_11 = arith.constant 0 : index
    %15 = vector.load %arg4[%c0_9, %c0_10, %c0_11] : memref<1x8x32xf32, #tpu.memory_space<vmem>>, vector<1x8x32xf32>
    %16 = vector.shape_cast %15 : vector<1x8x32xf32> to vector<8x32xf32>
    %17 = vector.shape_cast %14 : vector<8x32xf32> to vector<1x8x32xf32>
    tpu.vector_store %arg4[%c0_9, %c0_10, %c0_11], %17 {strides = array<i32>} : memref<1x8x32xf32, #tpu.memory_space<vmem>>, vector<1x8x32xf32>,
    %c0_12 = arith.constant 0 : index
    %c0_13 = arith.constant 0 : index
    %c0_14 = arith.constant 0 : index
    %18 = vector.load %arg5[%c0_12, %c0_13, %c0_14] : memref<1x8x32xf32, #tpu.memory_space<vmem>>, vector<1x8x32xf32>
    %19 = vector.shape_cast %18 : vector<1x8x32xf32> to vector<8x32xf32>
    %20 = arith.mulf %10, %10 : vector<1x8x32xf32>
    %cst_15 = arith.constant dense<0.000000e+00> : vector<8x32xf32>
    %21 = vector.multi_reduction <add>, %20, %cst_15 [0] : vector<1x8x32xf32> to vector<8x32xf32>
    %22 = arith.addf %19, %21 : vector<8x32xf32>
    %c0_16 = arith.constant 0 : index
    %c0_17 = arith.constant 0 : index
    %c0_18 = arith.constant 0 : index
    %23 = vector.load %arg5[%c0_16, %c0_17, %c0_18] : memref<1x8x32xf32, #tpu.memory_space<vmem>>, vector<1x8x32xf32>
    %24 = vector.shape_cast %23 : vector<1x8x32xf32> to vector<8x32xf32>
    %25 = vector.shape_cast %22 : vector<8x32xf32> to vector<1x8x32xf32>
    tpu.vector_store %arg5[%c0_16, %c0_17, %c0_18], %25 {strides = array<i32>} : memref<1x8x32xf32, #tpu.memory_space<vmem>>, vector<1x8x32xf32>,
    return
  }
  func.func @transform_0(%arg0: i32, %arg1: i32) -> (i32, i32, i32) {
    %c0_i32 = arith.constant 0 : i32
    %c0_i32_0 = arith.constant 0 : i32
    %c0_i32_1 = arith.constant 0 : i32
    return %arg0, %c0_i32, %c0_i32_0 : i32, i32, i32
  }
  func.func @transform_1(%arg0: i32, %arg1: i32) -> (i32, i32, i32) {
    %c0_i32 = arith.constant 0 : i32
    %c0_i32_0 = arith.constant 0 : i32
    return %arg0, %arg1, %c0_i32 : i32, i32, i32
  }
  func.func @transform_2(%arg0: i32, %arg1: i32) -> (i32, i32, i32) {
    %c0_i32 = arith.constant 0 : i32
    %c0_i32_0 = arith.constant 0 : i32
    %c0_i32_1 = arith.constant 0 : i32
    return %arg0, %c0_i32, %c0_i32_0 : i32, i32, i32
  }
  func.func @transform_3(%arg0: i32, %arg1: i32) -> (i32, i32, i32) {
    %c0_i32 = arith.constant 0 : i32
    %c0_i32_0 = arith.constant 0 : i32
    %c0_i32_1 = arith.constant 0 : i32
    return %arg0, %c0_i32, %c0_i32_0 : i32, i32, i32
  }
}

module attributes {stable_mosaic.version = 11 : i64} {
  func.func @_apply_kernel(%arg0: i32, %arg1: i32, %arg2: i32, %arg3: memref<1x1x32xf32, #tpu.memory_space<vmem>>, %arg4: memref<1x8x32xf32, #tpu.memory_space<vmem>>, %arg5: memref<32x128xbf16, #tpu.memory_space<vmem>>, %arg6: memref<1x128xf32, #tpu.memory_space<vmem>>, %arg7: memref<1x8x128xf32, #tpu.memory_space<vmem>>) attributes {dimension_semantics = [#tpu.dimension_semantics<parallel>, #tpu.dimension_semantics<parallel>, #tpu.dimension_semantics<arbitrary>], iteration_bounds = array<i64: 2, 1, 1>, scalar_prefetch = 0 : i64, scratch_operands = 0 : i64, tpu.core_type = #tpu.core_type<tc>, window_params = [{transform_indices = @transform_0, window_bounds = array<i64: 1, 1, 32>}, {transform_indices = @transform_1, window_bounds = array<i64: 1, 8, 32>}, {transform_indices = @transform_2, window_bounds = array<i64: 32, 128>}, {transform_indices = @transform_3, window_bounds = array<i64: 1, 128>}, {transform_indices = @transform_4, window_bounds = array<i64: 1, 8, 128>}]} {
    %c0 = arith.constant 0 : index
    %c0_0 = arith.constant 0 : index
    %c0_1 = arith.constant 0 : index
    %0 = vector.load %arg3[%c0, %c0_0, %c0_1] : memref<1x1x32xf32, #tpu.memory_space<vmem>>, vector<1x1x32xf32>
    %1 = vector.shape_cast %0 : vector<1x1x32xf32> to vector<1x32xf32>
    %c0_2 = arith.constant 0 : index
    %c0_3 = arith.constant 0 : index
    %c0_4 = arith.constant 0 : index
    %2 = vector.load %arg4[%c0_2, %c0_3, %c0_4] : memref<1x8x32xf32, #tpu.memory_space<vmem>>, vector<1x8x32xf32>
    %3 = vector.shape_cast %2 : vector<1x8x32xf32> to vector<8x32xf32>
    %4 = vector.broadcast %1 : vector<1x32xf32> to vector<8x32xf32>
    %5 = arith.subf %4, %3 : vector<8x32xf32>
    %6 = arith.mulf %5, %5 : vector<8x32xf32>
    %7 = arith.truncf %6 : vector<8x32xf32> to vector<8x32xbf16>
    %c0_5 = arith.constant 0 : index
    %c0_6 = arith.constant 0 : index
    %8 = vector.load %arg5[%c0_5, %c0_6] : memref<32x128xbf16, #tpu.memory_space<vmem>>, vector<32x128xbf16>
    %cst = arith.constant dense<0.000000e+00> : vector<8x128xf32>
    %9 = tpu.matmul %7, %8, %cst {dimension_numbers = #tpu.dot_dimension_numbers<[1], [0], [0], [1], [0, 0, 1, 1], [], []>} : vector<8x32xbf16>, vector<32x128xbf16>, vector<8x128xf32> -> vector<8x128xf32>
    %c0_7 = arith.constant 0 : index
    %c0_8 = arith.constant 0 : index
    %10 = vector.load %arg6[%c0_7, %c0_8] : memref<1x128xf32, #tpu.memory_space<vmem>>, vector<1x128xf32>
    %11 = vector.broadcast %10 : vector<1x128xf32> to vector<8x128xf32>
    %12 = arith.addf %9, %11 : vector<8x128xf32>
    %c0_9 = arith.constant 0 : index
    %c0_10 = arith.constant 0 : index
    %c0_11 = arith.constant 0 : index
    %13 = vector.load %arg7[%c0_9, %c0_10, %c0_11] : memref<1x8x128xf32, #tpu.memory_space<vmem>>, vector<1x8x128xf32>
    %14 = vector.shape_cast %13 : vector<1x8x128xf32> to vector<8x128xf32>
    %15 = vector.shape_cast %12 : vector<8x128xf32> to vector<1x8x128xf32>
    tpu.vector_store %arg7[%c0_9, %c0_10, %c0_11], %15 {strides = array<i32>} : memref<1x8x128xf32, #tpu.memory_space<vmem>>, vector<1x8x128xf32>,
    return
  }
  func.func @transform_0(%arg0: i32, %arg1: i32, %arg2: i32) -> (i32, i32, i32) {
    %c0_i32 = arith.constant 0 : i32
    %c0_i32_0 = arith.constant 0 : i32
    %c0_i32_1 = arith.constant 0 : i32
    return %arg0, %c0_i32, %c0_i32_0 : i32, i32, i32
  }
  func.func @transform_1(%arg0: i32, %arg1: i32, %arg2: i32) -> (i32, i32, i32) {
    %c0_i32 = arith.constant 0 : i32
    %c0_i32_0 = arith.constant 0 : i32
    return %arg0, %arg2, %c0_i32 : i32, i32, i32
  }
  func.func @transform_2(%arg0: i32, %arg1: i32, %arg2: i32) -> (i32, i32) {
    %c0_i32 = arith.constant 0 : i32
    %c0_i32_0 = arith.constant 0 : i32
    return %c0_i32, %arg1 : i32, i32
  }
  func.func @transform_3(%arg0: i32, %arg1: i32, %arg2: i32) -> (i32, i32) {
    %c0_i32 = arith.constant 0 : i32
    %c0_i32_0 = arith.constant 0 : i32
    return %c0_i32, %arg1 : i32, i32
  }
  func.func @transform_4(%arg0: i32, %arg1: i32, %arg2: i32) -> (i32, i32, i32) {
    %c0_i32 = arith.constant 0 : i32
    return %arg0, %arg2, %arg1 : i32, i32, i32
  }
}

</mosaic_0001>

<bundles_post_ra>
// kernel: classifier_forward.2
= control target key start
LH: loop header
LB: loop body
LE: loop exit
PB: predicated region body
PF: predicated region fallthrough
CT: control target
= control target key end

     0   :  { %9 = vsyncpa [#allocation3], 0  ;;  %s648_s0 = inlined_call_operand.vmem [shape: f32[2,1,32], index: 0, kind: input, shape index: {}]   ;;  %s649_s1 = inlined_call_operand.hbm [shape: f32[2,8,32], index: 1, kind: input, shape index: {}]   ;;  %s650_s2 = inlined_call_operand.vmem [shape: f32[2,8,32], index: 2, kind: output, shape index: {0}]   ;;  %s651_s3 = inlined_call_operand.vmem [shape: f32[2,8,32], index: 3, kind: output, shape index: {1}]  }
   0x1   :  { %11 = vsyncpa [#allocation3 + $0x1], 0  ;;  %s538_s12 = smov 0   ;;  %s540_s13 = smov 0  }
   0x2   :  { %s542_s14 = smov 0   ;;  %s544_s15 = smov 0  }
   0x3   :  { %s546_s16 = smov 0   ;;  %s548_s17 = smov 0  }
   0x4 LB: > { %s367_s18 = sadd.s32 4294967295, %s514_s17   ;;  %s29_s19 = sadd.s32 1, %s510_s16  ;;  %s514_s17 = sphi %s548_s17, %s17_s17   ;;  %s510_s16 = sphi %s546_s16, %s659_s16   ;;  %s506_s15 = sphi %s544_s15, %s658_s15   ;;  %s502_s14 = sphi %s542_s14, %s657_s14   ;;  %s498_s13 = sphi %s540_s13, %s656_s13   ;;  %s494_s12 = sphi %s538_s12, %s655_s12  }
   0x5   : > { %p31_p0 = scmp.ge.s32.totalorder %s29_s19, 2  ;;  %s64_s20 = sadd.s32 1, %s502_s14 }
   0x6   : > { %p71_p1 = scmp.ne.s32.totalorder %s502_s14, %s498_s13  ;;  %p72_p2 = scmp.eq.s32.totalorder %s514_s17, 0 }
   0x7   : > { %s661_s19 = smov (%p31_p0, %s29_s19), 0  ;;  %p77_p4 = scmp.ne.s32.totalorder %s498_s13, %s494_s12 }
   0x8   : > { %p574_p3 = por %p72_p2, %p71_p1  ;;  %s59_s22 = ssub.s32 %s510_s16, %s661_s19 }
   0x9   : > { %p78_p5 = scmp.eq.s32.totalorder %s367_s18, 0  ;;  %p62_p6 = scmp.eq.s32.totalorder %s59_s22, 0 }
   0xa   : > { %p386_p8 = scmp.lt.s32.totalorder %s514_s17, 2  ;;  %s159_s25 = sand.u32 1, %s502_s14  }
   0xb   : > { %p581_p7 = por %p78_p5, %p77_p4  ;;  %s372_s26 = sshll.u32 %s510_s16, 7 }
   0xc   : > { %s587_s24 = scalar_select %p62_p6, %s502_s14, %s64_s20  }
   0xd   : > { %s371_s27 = sshll.u32 %s159_s25, 3  ;;  %s169_s30 = scalar_lea.hbm %s649_s1, %s372_s26 }
   0xe   : > { %s163_s4 = scalar_lea.vmem [#allocation2], %s371_s27  ;;  %p596_p9 = pnand %p386_p8, %p574_p3 }
   0xf   : > { %s171_s5 = sshll.u32 %s163_s4, 4  ;;  %p373_p10 = scmp.ge.s32.totalorder %s514_s17, 1  ;;  %s172_s5 = int_to_ptr.vmem [resolvable:$true] %s171_s5 }
  0x10   : > { %p176_p11 = scmp.lt.s32.totalorder %s514_s17, 3  ;;  %s160_s7 = scalar_lea.sflag [#allocation3], %s159_s25 }
  0x11   : > { %p438_p12 = pneg %p596_p9  ;;  %s449_s8 = scalar_lea.vmem %s172_s5, 128 }
  0x12   : > { %p450_p13 = scmp.ne.s32.totalorder %s172_s5, %s449_s8  ;;  %s516_s9 = smov [#allocation2]  }
  0x13   : > { %s454_s10 = sshll.u32 %s516_s9, 4  ;;  %s455_s10 = int_to_ptr.vmem [resolvable:$false] %s454_s10 }
  0x14   : > { %p452_p0 = pnand %p450_p13, %p438_p12  ;;  %s456_s11 = scalar_lea.vmem %s455_s10, 256 }
  0x15   : > { %p457_p2 = scmp.lt.s32.totalorder %s172_s5, %s455_s10  ;;  %p458_p3 = scmp.lt.s32.totalorder %s456_s11, %s449_s8 }
  0x16   : > { %p453_p1 = pneg %p452_p0 }
  0x17   : > { %p459_p4 = por %p458_p3, %p457_p2 }
  0x19   : > { %p460_p5 = pnand %p459_p4, %p453_p1 }
  0x1b   : > { %463 = shalt.err (!%p460_p5)
}
  0x1c   : > { %385 = dma.hbm_to_vmem [thread:$0]  (!%p596_p9), %s169_s30, 128, %s172_s5, %s160_s7  }
  0x1d   : > { %p177_p6 = pnand %p373_p10, %p176_p11 }
  0x1e   : > { %s182_s12 = sand.u32 (!%p177_p6), 1, %s498_s13  }
  0x1f   : > { %180 = sbr.rel (%p177_p6) target bundleno = 54 (0x36), region = 28  ;;  %s374_s18 = sshll.u32 (!%p177_p6), %s182_s12, 3 }
  0x20   : > { %s183_s20 = scalar_lea.sflag (!%p177_p6), [#allocation3], %s182_s12  ;;  %s186_s21 = scalar_lea.vmem (!%p177_p6), [#allocation2], %s374_s18 }
  0x24   : > { %489 = dma.done.wait (%p581_p7), %s183_s20, 128  }
  0x25   : > { %491 = vsyncadd (%p581_p7), %s183_s20, 4294967168  ;;  %p215_p8 = scmp.lt.s32.totalorder %s506_s15, 1  ;;  %vm230_vm0 = vcmask 261120   ;;  %v517_v0 = vmov 0.0   ;;  %v234_v2 = vld [vmem:[%s186_s21] sm:$0xff] }
  0x27   : > { %s663_s15 = smov (!%p215_p8, %s506_s15), 1 }
  0x28   : > { %s217_s26 = scalar_lea.vmem %s648_s0, %s663_s15  ;;  %s375_s27 = sshll.u32 %s663_s15, 3 }
  0x29   : > { %s221_s30 = scalar_lea.vmem %s650_s2, %s375_s27  ;;  %s225_s6 = scalar_lea.vmem %s651_s3, %s375_s27  ;;  %v377_v1 = vld [vmem:[%s217_s26] ss:$0 sm:$0xff] }
  0x2a   : > { %231 = vst.msk [vmem:[%s221_s30] sm:$0xff] %vm230_vm0, %v517_v0  ;;  %232 = vst.msk [vmem:[%s225_s6] sm:$0xff] %vm230_vm0, %v517_v0  ;;  %v241_v3 = vsub.f32 %v377_v1, %v234_v2 }
  0x2c   : > { %v242_v4 = vmul.f32 %v241_v3, %v241_v3 }
  0x2e   : > { %v249_v5 = vmul.f32 %v242_v4, %v242_v4 }
  0x31   : > { %v243_v6 = vld [vmem:[%s221_s30] sm:$0xff] }
  0x32   : > { %v248_v7 = vld [vmem:[%s225_s6] sm:$0xff]  ;;  %v245_v8 = vadd.f32 %v243_v6, %v242_v4 }
  0x33   : > { %v251_v9 = vadd.f32 %v249_v5, %v248_v7 }
  0x34   : > { %247 = vst.msk [vmem:[%s221_s30] sm:$0xff] %vm230_vm0, %v245_v8 }
  0x35   : > { %252 = vst.msk [vmem:[%s225_s6] sm:$0xff] %vm230_vm0, %v251_v9 }
  0x36 PF: > { %s17_s17 = sadd.s32 1, %s514_s17   ;;  %s655_s12 = smov %s498_s13 }
  0x37   : > { %p14_p7 = scmp.ge.s32.totalorder %s17_s17, 4   ;;  %s656_s13 = smov %s502_s14 }
  0x38   : > { %s657_s14 = smov %s587_s24  ;;  %s658_s15 = smov %s510_s16 }
  0x39   : > { %s659_s16 = smov %s661_s19  ;;  %16 = sbr.rel (!%p14_p7) target bundleno = 4 (0x4), region = 87 }
  0x3e   :  { %286 = vsyncpa [#allocation3], 1 }
  0x3f   :  { %288 = vsyncpa [#allocation3 + $0x1], 1 }

// kernel: classifier_forward.3
= control target key start
LH: loop header
LB: loop body
LE: loop exit
PB: predicated region body
PF: predicated region fallthrough
CT: control target
= control target key end

     0   :  { %9 = vsyncpa [#allocation3], 0  ;;  %s796_s0 = inlined_call_operand.vmem [shape: f32[2,1,32], index: 0, kind: input, shape index: {}]   ;;  %s797_s1 = inlined_call_operand.vmem [shape: f32[2,8,32], index: 1, kind: input, shape index: {}]   ;;  %s798_s2 = inlined_call_operand.vmem [shape: bf16[32,128], index: 2, kind: input, shape index: {}]   ;;  %s799_s3 = inlined_call_operand.vmem [shape: f32[1,128], index: 3, kind: input, shape index: {}]   ;;  %s800_s4 = inlined_call_operand.hbm [shape: f32[2,8,128], index: 4, kind: output, shape index: {}]  }
   0x1   :  { %11 = vsyncpa [#allocation3 + $0x1], 0  ;;  %s673_s15 = smov 0   ;;  %s675_s16 = smov 0  }
   0x2   :  { %s677_s17 = smov 0   ;;  %s679_s18 = smov 0  }
   0x3   :  { %s681_s19 = smov 0   ;;  %s683_s20 = smov 0  }
   0x4 LB: > { %s479_s21 = sadd.s32 4294967295, %s643_s20   ;;  %s480_s22 = sadd.s32 4294967294, %s643_s20   ;;  %s643_s20 = sphi %s683_s20, %s17_s20   ;;  %s639_s19 = sphi %s681_s19, %s807_s19   ;;  %s635_s18 = sphi %s679_s18, %s806_s18   ;;  %s631_s17 = sphi %s677_s17, %s805_s17   ;;  %s627_s16 = sphi %s675_s16, %s804_s16   ;;  %s623_s15 = sphi %s673_s15, %s803_s15  }
   0x5   : > { %s36_s23 = sadd.s32 1, %s639_s19  ;;  %s153_s24 = sadd.s32 1, %s631_s17 }
   0x6   : > { %p38_p0 = scmp.ge.s32.totalorder %s36_s23, 2  ;;  %p163_p1 = scmp.ne.s32.totalorder %s631_s17, %s627_s16 }
   0x7   : > { %p164_p2 = scmp.eq.s32.totalorder %s479_s21, 1  ;;  %p169_p3 = scmp.ne.s32.totalorder %s627_s16, %s623_s15 }
   0x8   : > { %s809_s23 = smov (%p38_p0, %s36_s23), 0  ;;  %p170_p5 = scmp.eq.s32.totalorder %s480_s22, 1 }
   0x9   : > { %p713_p4 = por %p164_p2, %p163_p1  ;;  %s146_s26 = ssub.s32 %s639_s19, %s809_s23 }
   0xa   : > { %p485_p6 = scmp.ge.s32.totalorder %s643_s20, 1  ;;  %p151_p7 = scmp.eq.s32.totalorder %s146_s26, 0 }
   0xb   : > { %p720_p8 = por %p170_p5, %p169_p3  ;;  %p217_p9 = scmp.lt.s32.totalorder %s643_s20, 3 }
   0xc   : > { %s726_s28 = scalar_select %p151_p7, %s631_s17, %s153_s24  }
   0xd   : > { %p218_p10 = pnand %p485_p6, %p217_p9 }
   0xe   : > { %p255_p11 = scmp.lt.s32.totalorder (!%p218_p10), %s635_s18, 1  ;;  %s252_s21 = sand.u32 (!%p218_p10), 1, %s627_s16  }
   0xf   : > { %221 = sbr.rel (%p218_p10) target bundleno = 240 (0xf0), region = 36  ;;  %s486_s22 = sshll.u32 (!%p218_p10), %s252_s21, 3 }
  0x10   : > { %s494_s29 = sshll.u32 (!%p218_p10), %s635_s18, 7  ;;  %s254_s30 = scalar_lea.vmem (!%p218_p10), [#allocation2], %s486_s22 }
  0x11   : > { %s368_s5 = sshll.u32 (!%p218_p10), %s254_s30, 4  ;;  %s750_s8 = scalar_lea.hbm (!%p218_p10), %s800_s4, %s494_s29  ;;  %s752_s5 = int_to_ptr.vmem [resolvable:$true] %s368_s5 }
  0x12   : > { %s353_s9 = scalar_lea.sflag (!%p218_p10), [#allocation3], %s252_s21 }
  0x14   : > { %v565_v0 = vld [vmem:[%s798_s2 + $0x8] sm:$0xff]   ;;  %v645_v1 = vmov 0.0   ;;  %v566_v2 = vld [vmem:[%s798_s2] sm:$0xff]   ;;  %vm646_vm0 = vmmov 0   ;;  %s256_s7 = scalar_select %p255_p11, %s635_s18, 1  ;;  %vm307_vm1 = vcmask 261120  }
  0x15   : > { %500 = vmatprep.subr.bf16.mxu0 %v645_v1  ;;  %504 = vmatprep.mubr.msk.bf16.mxu0 %vm646_vm0, %v645_v1  ;;  %v489_v8 = vld [vmem:[%s799_s3] ss:$0 sm:$0xff]  ;;  %s647_s18 = smov [#allocation2]  }
  0x16   : > { %501 = vmatpush3.bf16.msra.mxu0 %v565_v0  ;;  %s257_s10 = scalar_lea.vmem %s796_s0, %s256_s7  ;;  %s487_s11 = sshll.u32 %s256_s7, 3 }
  0x17   : > { %502 = vmatprep.subr.bf16.mxu0 %v645_v1  ;;  %s264_s14 = scalar_lea.vmem %s797_s1, %s487_s11  ;;  %v488_v3 = vld [vmem:[%s257_s10] ss:$0 sm:$0xff]  ;;  %s567_s10 = scalar_lea.vmem %s752_s5, 128 }
  0x18   : > { %v274_v4 = vld [vmem:[%s264_s14] sm:$0xff]  ;;  %p568_p12 = scmp.ne.s32.totalorder %s752_s5, %s567_s10  ;;  %s571_s11 = sshll.u32 %s647_s18, 4  ;;  %s572_s11 = int_to_ptr.vmem [resolvable:$false] %s571_s11 }
  0x19   : > { %v281_v5 = vsub.f32 %v488_v3, %v274_v4  ;;  %s573_s12 = scalar_lea.vmem %s572_s11, 256  ;;  %p574_p1 = scmp.lt.s32.totalorder %s752_s5, %s572_s11 }
  0x1a   : > { %503 = vmatpush3.bf16.msra.mxu0 %v566_v2  ;;  %p569_p13 = pnand %p568_p12, %p713_p4  ;;  %p575_p2 = scmp.lt.s32.totalorder %s573_s12, %s567_s10 }
  0x1b   : > { %v282_v6 = vmul.f32 %v281_v5, %v281_v5 }
  0x1c   : > { %p570_p0 = pneg %p569_p13  ;;  %p576_p3 = por %p575_p2, %p574_p1 }
  0x1d   : > { %v283_v7 = vpack.c.bf16 %v282_v6, %v282_v6 }
  0x1e   : > { %p577_p5 = pnand %p576_p3, %p570_p0 }
  0x1f   : > { %505 = vmatmul.mubr.msk.bf16.vlgmr.msra.gmra.mxu0 %vm307_vm1, %v283_v7 }
  0xdf   : > { %v345_v9 = vpop.f32.mrf.mxu0 }
  0xe0   : > { %v346_v10 = vadd.f32 %v489_v8, %v345_v9 }
  0xe1   : > { %v506_v11 = vpop.f32.mrf.mxu0 }
  0xe2   : > { %351 = vst [vmem:[%s254_s30] sm:$0xff] %v346_v10 }
  0xe3   : > { %v348_v12 = vpop.f32.mrf.mxu0 }
  0xe4   : > { %580 = shalt.err (!%p577_p5)
}
  0xe5   : > { %s581_s13 = scalar_lea.hbm %s750_s8, 128  ;;  %s585_s22 = scalar_lea.hbm %s800_s4, 256 }
  0xe6   : > { %p582_p6 = scmp.ne.s32.totalorder %s750_s8, %s581_s13  ;;  %p586_p10 = scmp.lt.s32.totalorder %s750_s8, %s800_s4 }
  0xe7   : > { %p587_p11 = scmp.lt.s32.totalorder %s585_s22, %s581_s13 }
  0xe8   : > { %p583_p7 = pnand %p582_p6, %p713_p4 }
  0xe9   : > { %p588_p12 = por %p587_p11, %p586_p10 }
  0xea   : > { %p584_p9 = pneg %p583_p7 }
  0xec   : > { %p589_p13 = pnand %p588_p12, %p584_p9 }
  0xee   : > { %592 = shalt.err (!%p589_p13)
}
  0xef   : > { %508 = dma.vmem_to_hbm [thread:$0]  (%p713_p4), %s752_s5, 128, %s750_s8, %s353_s9   ;;  %v507_v13 = vpop.f32.mrf.mxu0 }
  0xf0 PF: > { %p514_p0 = scmp.ge.s32.totalorder %s643_s20, 2  ;;  %s380_s29 = sand.u32 1, %s623_s15  }
  0xf1   : > { %s381_s30 = scalar_lea.sflag [#allocation3], %s380_s29 }
  0xf2   : > { %p511_p1 = pnand %p514_p0, %p720_p8 }
  0xf4   : > { %p512_p2 = pneg %p511_p1 }
  0xf6   : > { %618 = dma.done.wait (%p512_p2), %s381_s30, 128  }
  0xf7   : > { %620 = vsyncadd (%p512_p2), %s381_s30, 4294967168  ;;  %s17_s20 = sadd.s32 1, %s643_s20   ;;  %s803_s15 = smov %s627_s16 }
  0xf8   : > { %p14_p3 = scmp.ge.s32.totalorder %s17_s20, 4   ;;  %s804_s16 = smov %s631_s17 }
  0xf9   : > { %s805_s17 = smov %s726_s28  ;;  %s806_s18 = smov %s639_s19 }
  0xfa   : > { %s807_s19 = smov %s809_s23  ;;  %16 = sbr.rel (!%p14_p3) target bundleno = 4 (0x4), region = 80 }
  0xff   :  { %386 = vsyncpa [#allocation3], 1 }
 0x100   :  { %388 = vsyncpa [#allocation3 + $0x1], 1 }

</bundles_post_ra>
